<compile_context>
chip_gen: v7x
topology: tpu7x:2x2x1
jax: 0.10.0
libtpu: 0.0.40
codegen_flags: <defaults>
</compile_context>

<pallas_src>
import jax
import jax.numpy as jnp
from jax.experimental import pallas as pl
from jax.experimental.pallas import tpu as pltpu


def _round_up(x, m):
    return ((x + m - 1) // m) * m


def critic_kernel(s_ref, a_ref, ws_ref, wa_ref, b_ref, wo_ref, bo_ref, out_ref):
    # First layer: two small MXU dots against resident weights, f32 accumulate,
    # fused hidden bias (bs + ba), ReLU.
    h = (jnp.dot(s_ref[...], ws_ref[...], preferred_element_type=jnp.float32)
         + jnp.dot(a_ref[...], wa_ref[...], preferred_element_type=jnp.float32)
         + b_ref[...])
    h = jnp.maximum(h, 0.0)
    # 30 -> 1 projection on the idle MXU against h.T so the result is
    # batch-on-lanes (lane-dense store).  wo_ref is (8, 30) with rows 1..7
    # zero so the matmul has a native-sublane M; only row 0 is real.
    q8 = jnp.dot(wo_ref[...], h.T, preferred_element_type=jnp.float32)
    out_ref[...] = (q8[0:1, :] + bo_ref[0]).astype(out_ref.dtype)


def prepare_params(ws, bs, wa, ba, wo, bo):
    """Package params into the layout the kernel expects.

    ws: [s_dim, 30], wa: [a_dim, 30] (PyTorch weight.T), bs/ba: [1, 30],
    wo: [30, 1], bo: [1, 1].
    """
    b_sa = (bs + ba).reshape(1, -1).astype(jnp.float32)          # fused hidden bias
    wo8 = jnp.zeros((8, wo.shape[0]), jnp.float32).at[0].set(wo.reshape(-1))
    bo_s = bo.reshape(1).astype(jnp.float32)                     # SMEM scalar
    return ws, wa, b_sa, wo8, bo_s


def critic_forward(s, a, params, block_b=None, block_b_cap=4096):
    """s: [B, s_dim], a: [B, a_dim] -> q: [B, 1] (float32).

    Activations may be f32 or bf16; accumulation is always f32.
    """
    ws, wa, b_sa, wo8, bo_s = params
    B, s_dim = s.shape
    a_dim = a.shape[1]
    H = ws.shape[1]

    # First-layer matmul inputs stay in the activations' dtype (bf16 from the
    # producer halves HBM read bytes); resident weights are tiny, cast freely.
    cdt = s.dtype
    ws = ws.astype(cdt)
    wa = wa.astype(cdt)
    a = a.astype(cdt)

    b_pad = _round_up(B, 128)
    if block_b is None:
        # Prefer >= 2 grid steps when there is enough work (v7x has 2 TCs),
        # then take the largest multiple-of-128 divisor of b_pad <= cap so no
        # extra padding is introduced beyond the 128-row round-up.
        if b_pad <= 128:
            target = 128
        else:
            target = min(block_b_cap, _round_up(pl.cdiv(b_pad, 2), 128))
        block_b = 128
        cand = 128
        while cand <= target:
            if b_pad % cand == 0:
                block_b = cand
            cand += 128
    grid = (b_pad // block_b,)

    if b_pad != B:
        # Only hit when B is not a multiple of 128 (negligible at demo scale).
        # At training scale keep B a multiple of 128 to avoid this extra copy
        # of the dominant input.
        s = jnp.pad(s, ((0, b_pad - B), (0, 0)))
        a = jnp.pad(a, ((0, b_pad - B), (0, 0)))

    q_row = pl.pallas_call(
        critic_kernel,
        out_shape=jax.ShapeDtypeStruct((1, b_pad), jnp.float32),
        grid=grid,
        in_specs=[
            pl.BlockSpec((block_b, s_dim), lambda i: (i, 0)),    # s batch tile
            pl.BlockSpec((block_b, a_dim), lambda i: (i, 0)),    # a batch tile
            pl.BlockSpec((s_dim, H), lambda i: (0, 0)),          # ws (resident)
            pl.BlockSpec((a_dim, H), lambda i: (0, 0)),          # wa (resident)
            pl.BlockSpec((1, H), lambda i: (0, 0)),              # fused hidden bias
            pl.BlockSpec((8, H), lambda i: (0, 0)),              # wo padded to 8 rows
            pl.BlockSpec((1,), lambda i: (0,),
                         memory_space=pltpu.MemorySpace.SMEM),   # scalar out bias
        ],
        out_specs=pl.BlockSpec((1, block_b), lambda i: (0, i)),  # lane-dense row
        compiler_params=pltpu.CompilerParams(
            dimension_semantics=("parallel",),                   # batch split across TCs
            vmem_limit_bytes=40 * 1024 * 1024,                   # covers v5e's 16 MiB default
        ),
    )(s, a, ws, wa, b_sa, wo8, bo_s)
    return q_row[0, :B].reshape(B, 1)


def init_params(key, s_dim, a_dim, hidden=30):
    """Deterministic synthetic init mirroring the PyTorch module's shapes.

    PyTorch stores Linear weights as [out, in]; we store them transposed
    ([in, out]) so the kernel uses x @ W directly.
    """
    k = jax.random.split(key, 6)
    ws = (0.1 * jax.random.normal(k[0], (s_dim, hidden))).astype(jnp.float32)
    wa = (0.1 * jax.random.normal(k[1], (a_dim, hidden))).astype(jnp.float32)
    wo = (0.1 * jax.random.normal(k[2], (hidden, 1))).astype(jnp.float32)
    # PyTorch default bias init: U(-1/sqrt(fan_in), 1/sqrt(fan_in))
    bs = jax.random.uniform(k[3], (1, hidden),
                            minval=-1.0 / jnp.sqrt(s_dim),
                            maxval=1.0 / jnp.sqrt(s_dim)).astype(jnp.float32)
    ba = jax.random.uniform(k[4], (1, hidden),
                            minval=-1.0 / jnp.sqrt(a_dim),
                            maxval=1.0 / jnp.sqrt(a_dim)).astype(jnp.float32)
    bo = jax.random.uniform(k[5], (1, 1),
                            minval=-1.0 / jnp.sqrt(hidden),
                            maxval=1.0 / jnp.sqrt(hidden)).astype(jnp.float32)
    return ws, bs, wa, ba, wo, bo


if __name__ == "__main__":
    key = jax.random.PRNGKey(0)
    B, s_dim, a_dim = 4, 8, 4

    k_s, k_a, k_p = jax.random.split(key, 3)
    s = jax.random.normal(k_s, (B, s_dim), dtype=jnp.float32)
    a = jax.random.normal(k_a, (B, a_dim), dtype=jnp.float32)
    ws, bs, wa, ba, wo, bo = init_params(k_p, s_dim, a_dim)
    params = prepare_params(ws, bs, wa, ba, wo, bo)

    # Pure-JAX reference of the original module's math.
    q_ref = jnp.maximum(s @ ws + bs + a @ wa + ba, 0.0) @ wo + bo

    # f32 activations: bit-tight check.
    q = critic_forward(s, a, params)
    jax.block_until_ready(q)
    assert q.shape == (B, 1)
    assert jnp.allclose(q, q_ref, atol=1e-5), "f32 mismatch vs reference"

    # bf16 activations (as if the producer emitted bf16): halves HBM reads.
    q_bf = critic_forward(s.astype(jnp.bfloat16), a.astype(jnp.bfloat16), params)
    jax.block_until_ready(q_bf)
    assert jnp.allclose(q_bf, q_ref, atol=5e-2, rtol=5e-2), "bf16 mismatch vs reference"

    print("KERNEL_OK")
</pallas_src>

<mosaic_0001>
module attributes {stable_mosaic.version = 11 : i64} {
  func.func @critic_kernel(%arg0: i32, %arg1: memref<128x8xf32, #tpu.memory_space<vmem>>, %arg2: memref<128x4xf32, #tpu.memory_space<vmem>>, %arg3: memref<8x30xf32, #tpu.memory_space<vmem>>, %arg4: memref<4x30xf32, #tpu.memory_space<vmem>>, %arg5: memref<1x30xf32, #tpu.memory_space<vmem>>, %arg6: memref<8x30xf32, #tpu.memory_space<vmem>>, %arg7: memref<1xf32, #tpu.memory_space<smem>>, %arg8: memref<1x128xf32, #tpu.memory_space<vmem>>) attributes {dimension_semantics = [#tpu.dimension_semantics<parallel>], iteration_bounds = array<i64: 1>, scalar_prefetch = 0 : i64, scratch_operands = 0 : i64, tpu.core_type = #tpu.core_type<tc>, window_params = [{transform_indices = @transform_0, window_bounds = array<i64: 128, 8>}, {transform_indices = @transform_1, window_bounds = array<i64: 128, 4>}, {pipeline_mode = #tpu.pipeline_mode<synchronous>, transform_indices = @transform_2, window_bounds = array<i64: 8, 30>}, {pipeline_mode = #tpu.pipeline_mode<synchronous>, transform_indices = @transform_3, window_bounds = array<i64: 4, 30>}, {pipeline_mode = #tpu.pipeline_mode<synchronous>, transform_indices = @transform_4, window_bounds = array<i64: 1, 30>}, {pipeline_mode = #tpu.pipeline_mode<synchronous>, transform_indices = @transform_5, window_bounds = array<i64: 8, 30>}, {transform_indices = @transform_6, window_bounds = array<i64: 1>}, {transform_indices = @transform_7, window_bounds = array<i64: 1, 128>}]} {
    %c0 = arith.constant 0 : index
    %c0_0 = arith.constant 0 : index
    %0 = vector.load %arg1[%c0, %c0_0] : memref<128x8xf32, #tpu.memory_space<vmem>>, vector<128x8xf32>
    %c0_1 = arith.constant 0 : index
    %c0_2 = arith.constant 0 : index
    %1 = vector.load %arg3[%c0_1, %c0_2] : memref<8x30xf32, #tpu.memory_space<vmem>>, vector<8x30xf32>
    %cst = arith.constant dense<0.000000e+00> : vector<128x30xf32>
    %2 = tpu.matmul %0, %1, %cst {dimension_numbers = #tpu.dot_dimension_numbers<[1], [0], [0], [1], [0, 0, 1, 1], [], []>} : vector<128x8xf32>, vector<8x30xf32>, vector<128x30xf32> -> vector<128x30xf32>
    %c0_3 = arith.constant 0 : index
    %c0_4 = arith.constant 0 : index
    %3 = vector.load %arg2[%c0_3, %c0_4] : memref<128x4xf32, #tpu.memory_space<vmem>>, vector<128x4xf32>
    %c0_5 = arith.constant 0 : index
    %c0_6 = arith.constant 0 : index
    %4 = vector.load %arg4[%c0_5, %c0_6] : memref<4x30xf32, #tpu.memory_space<vmem>>, vector<4x30xf32>
    %cst_7 = arith.constant dense<0.000000e+00> : vector<128x30xf32>
    %5 = tpu.matmul %3, %4, %cst_7 {dimension_numbers = #tpu.dot_dimension_numbers<[1], [0], [0], [1], [0, 0, 1, 1], [], []>} : vector<128x4xf32>, vector<4x30xf32>, vector<128x30xf32> -> vector<128x30xf32>
    %6 = arith.addf %2, %5 : vector<128x30xf32>
    %c0_8 = arith.constant 0 : index
    %c0_9 = arith.constant 0 : index
    %7 = vector.load %arg5[%c0_8, %c0_9] : memref<1x30xf32, #tpu.memory_space<vmem>>, vector<1x30xf32>
    %8 = vector.broadcast %7 : vector<1x30xf32> to vector<128x30xf32>
    %9 = arith.addf %6, %8 : vector<128x30xf32>
    %cst_10 = arith.constant 0.000000e+00 : f32
    %10 = vector.broadcast %cst_10 : f32 to vector<128x30xf32>
    %11 = arith.maximumf %9, %10 : vector<128x30xf32>
    %c0_11 = arith.constant 0 : index
    %c0_12 = arith.constant 0 : index
    %12 = vector.load %arg6[%c0_11, %c0_12] : memref<8x30xf32, #tpu.memory_space<vmem>>, vector<8x30xf32>
    %13 = tpu.transpose %11, [1, 0] : vector<128x30xf32> -> vector<30x128xf32>
    %cst_13 = arith.constant dense<0.000000e+00> : vector<8x128xf32>
    %14 = tpu.matmul %12, %13, %cst_13 {dimension_numbers = #tpu.dot_dimension_numbers<[1], [0], [0], [1], [0, 0, 1, 1], [], []>} : vector<8x30xf32>, vector<30x128xf32>, vector<8x128xf32> -> vector<8x128xf32>
    %15 = vector.extract_strided_slice %14 {offsets = [0, 0], sizes = [1, 128], strides = [1, 1]} : vector<8x128xf32> to vector<1x128xf32>
    %c0_14 = arith.constant 0 : index
    %16 = memref.load %arg7[%c0_14] : memref<1xf32, #tpu.memory_space<smem>>
    %17 = vector.broadcast %16 : f32 to vector<1x128xf32>
    %18 = arith.addf %15, %17 : vector<1x128xf32>
    %c0_15 = arith.constant 0 : index
    %c0_16 = arith.constant 0 : index
    %19 = vector.load %arg8[%c0_15, %c0_16] : memref<1x128xf32, #tpu.memory_space<vmem>>, vector<1x128xf32>
    tpu.vector_store %arg8[%c0_15, %c0_16], %18 {strides = array<i32>} : memref<1x128xf32, #tpu.memory_space<vmem>>, vector<1x128xf32>,
    return
  }
  func.func @transform_0(%arg0: i32) -> (i32, i32) {
    %c0_i32 = arith.constant 0 : i32
    %c0_i32_0 = arith.constant 0 : i32
    return %arg0, %c0_i32 : i32, i32
  }
  func.func @transform_1(%arg0: i32) -> (i32, i32) {
    %c0_i32 = arith.constant 0 : i32
    %c0_i32_0 = arith.constant 0 : i32
    return %arg0, %c0_i32 : i32, i32
  }
  func.func @transform_2(%arg0: i32) -> (i32, i32) {
    %c0_i32 = arith.constant 0 : i32
    %c0_i32_0 = arith.constant 0 : i32
    %c0_i32_1 = arith.constant 0 : i32
    return %c0_i32, %c0_i32_0 : i32, i32
  }
  func.func @transform_3(%arg0: i32) -> (i32, i32) {
    %c0_i32 = arith.constant 0 : i32
    %c0_i32_0 = arith.constant 0 : i32
    %c0_i32_1 = arith.constant 0 : i32
    return %c0_i32, %c0_i32_0 : i32, i32
  }
  func.func @transform_4(%arg0: i32) -> (i32, i32) {
    %c0_i32 = arith.constant 0 : i32
    %c0_i32_0 = arith.constant 0 : i32
    %c0_i32_1 = arith.constant 0 : i32
    return %c0_i32, %c0_i32_0 : i32, i32
  }
  func.func @transform_5(%arg0: i32) -> (i32, i32) {
    %c0_i32 = arith.constant 0 : i32
    %c0_i32_0 = arith.constant 0 : i32
    %c0_i32_1 = arith.constant 0 : i32
    return %c0_i32, %c0_i32_0 : i32, i32
  }
  func.func @transform_6(%arg0: i32) -> i32 {
    %c0_i32 = arith.constant 0 : i32
    %c0_i32_0 = arith.constant 0 : i32
    return %c0_i32 : i32
  }
  func.func @transform_7(%arg0: i32) -> (i32, i32) {
    %c0_i32 = arith.constant 0 : i32
    %c0_i32_0 = arith.constant 0 : i32
    return %c0_i32, %arg0 : i32, i32
  }
}

</mosaic_0001>

<bundles_post_ra>
// kernel: tpu_custom_call.1
= control target key start
LH: loop header
LB: loop body
LE: loop exit
PB: predicated region body
PF: predicated region fallthrough
CT: control target
= control target key end

     0   :  { %vm111_vm0 = vcmask 1043456   ;;  %vm62_vm1 = vcmask 31744   ;;  %s1129_s0 = inlined_call_operand.vmem [shape: f32[128,8], index: 0, kind: input, shape index: {}]   ;;  %s1130_s1 = inlined_call_operand.vmem [shape: f32[128,4], index: 1, kind: input, shape index: {}]   ;;  %s1131_s2 = inlined_call_operand.vmem [shape: f32[8,30], index: 2, kind: input, shape index: {}]   ;;  %s1132_s3 = inlined_call_operand.vmem [shape: f32[4,30], index: 3, kind: input, shape index: {}]   ;;  %s1133_s4 = inlined_call_operand.vmem [shape: f32[1,30], index: 4, kind: input, shape index: {}]   ;;  %s1134_s5 = inlined_call_operand.vmem [shape: f32[8,30], index: 5, kind: input, shape index: {}]   ;;  %s1135_s6 = inlined_call_operand.<no memory space> [shape: f32[1], index: 6, kind: input, shape index: {}]   ;;  %s1136_s7 = inlined_call_operand.hbm [shape: f32[1,128], index: 7, kind: output, shape index: {}]  }
   0x1   :  { %v61_v0 = vld [vmem:[%s1132_s3] sm:$0xf]  ;;  %v46_v2 = vld [vmem:[%s1130_s1 + $0x8] sm:$0xff]  ;;  %v47_v4 = vld [vmem:[%s1130_s1 + $0x10] sm:$0xff] }
   0x2   :  { %v45_v1 = vld [vmem:[%s1130_s1] sm:$0xff]  ;;  %736 = vmatprep.subr.msk.mxu0 %vm111_vm0, %v61_v0  ;;  %v48_v5 = vld [vmem:[%s1130_s1 + $0x18] sm:$0xff]  ;;  %v50_v7 = vld [vmem:[%s1130_s1 + $0x28] sm:$0xff] }
   0x3   :  { %738 = vmatprep.mubr.msk.f32.mxu0 %vm62_vm1, %v45_v1  ;;  %v44_v3 = vld [vmem:[%s1131_s2] sm:$0xff]  ;;  %737 = vmatpush3.msk.msra.mxu0 %vm111_vm0, %v61_v0  ;;  %v51_v8 = vld [vmem:[%s1130_s1 + $0x30] sm:$0xff] }
   0x4   :  { %739 = vmatmul.mubr.msk.f32.vlgmr.msra.gmra.mrb[0].mxu0 %vm62_vm1, %v46_v2  ;;  %762 = vmatprep.subr.mxu0 %v44_v3  ;;  %v49_v6 = vld [vmem:[%s1130_s1 + $0x20] sm:$0xff] }
   0x5   :  { %763 = vmatpush3.msra.mxu0 %v44_v3  ;;  %741 = vmatprep.mubr.msk.f32.mxu0 %vm62_vm1, %v47_v4 }
   0x8   :  { %742 = vmatmul.mubr.msk.f32.gmra.mrb[2].mxu0 %vm62_vm1, %v48_v5 }
   0x9   :  { %744 = vmatprep.mubr.msk.f32.mxu0 %vm62_vm1, %v49_v6 }
   0xc   :  { %745 = vmatmul.mubr.msk.f32.gmra.mrb[4].mxu0 %vm62_vm1, %v50_v7 }
   0xd   :  { %13 = vsyncpa [#allocation4], 0  ;;  %747 = vmatprep.mubr.msk.f32.mxu0 %vm62_vm1, %v51_v8  ;;  %v52_v9 = vld [vmem:[%s1130_s1 + $0x38] sm:$0xff]  ;;  %v53_v10 = vld [vmem:[%s1130_s1 + $0x40] sm:$0xff]  ;;  %vm260_vm2 = vcmask 64512   ;;  %v899_v34 = vmov 0.0|0.0  }
   0xe   :  { %v54_v11 = vld [vmem:[%s1130_s1 + $0x48] sm:$0xff]  ;;  %v55_v12 = vld [vmem:[%s1130_s1 + $0x50] sm:$0xff]  ;;  %v56_v13 = vld [vmem:[%s1130_s1 + $0x58] sm:$0xff]  ;;  %823 = vmatprep.subr.bf16.mxu1 %v899_v34  ;;  %vm900_vm3 = vmmov 0   ;;  %v901_v35 = vmov 0.0   ;;  %vm494_vm4 = vcmask 244736  }
   0xf   :  { %v57_v14 = vld [vmem:[%s1130_s1 + $0x60] sm:$0xff]  ;;  %v58_v15 = vld [vmem:[%s1130_s1 + $0x68] sm:$0xff]  ;;  %v59_v16 = vld [vmem:[%s1130_s1 + $0x70] sm:$0xff]  ;;  %820 = vmatprep.mubr.msk.f32.mxu1 %vm900_vm3, %v901_v35  ;;  %s902_s19 = smov [#allocation3]  }
  0x10   :  { %748 = vmatmul.mubr.msk.f32.gmra.mrb[6].mxu0 %vm62_vm1, %v52_v9  ;;  %v60_v17 = vld [vmem:[%s1130_s1 + $0x78] sm:$0xff]  ;;  %v28_v18 = vld [vmem:[%s1129_s0] sm:$0xff]  ;;  %v29_v19 = vld [vmem:[%s1129_s0 + $0x8] sm:$0xff]  ;;  %s626_s20 = sshll.u32 %s902_s19, 4  ;;  %s627_s20 = int_to_ptr.vmem [resolvable:$true] %s626_s20 }
  0x11   :  { %750 = vmatprep.mubr.msk.f32.mxu0 %vm62_vm1, %v53_v10  ;;  %v30_v20 = vld [vmem:[%s1129_s0 + $0x10] sm:$0xff]  ;;  %v31_v21 = vld [vmem:[%s1129_s0 + $0x18] sm:$0xff]  ;;  %v32_v22 = vld [vmem:[%s1129_s0 + $0x20] sm:$0xff]  ;;  %s875_s21 = scalar_lea.vmem %s627_s20, 16  ;;  %s879_s22 = scalar_lea.vmem %s627_s20, 32 }
  0x12   :  { %v33_v23 = vld [vmem:[%s1129_s0 + $0x28] sm:$0xff]  ;;  %v34_v24 = vld [vmem:[%s1129_s0 + $0x30] sm:$0xff]  ;;  %v35_v25 = vld [vmem:[%s1129_s0 + $0x38] sm:$0xff]  ;;  %p876_p0 = scmp.ne.s32.totalorder %s627_s20, %s875_s21  ;;  %p880_p1 = scmp.lt.s32.totalorder %s627_s20, %s627_s20 }
  0x13   :  { %v36_v26 = vld [vmem:[%s1129_s0 + $0x40] sm:$0xff]  ;;  %v37_v27 = vld [vmem:[%s1129_s0 + $0x48] sm:$0xff]  ;;  %v38_v28 = vld [vmem:[%s1129_s0 + $0x50] sm:$0xff]  ;;  %p881_p2 = scmp.lt.s32.totalorder %s879_s22, %s875_s21 }
  0x14   :  { %751 = vmatmul.mubr.msk.f32.gmra.mrb[8].mxu0 %vm62_vm1, %v54_v11  ;;  %v39_v29 = vld [vmem:[%s1129_s0 + $0x58] sm:$0xff]  ;;  %v40_v30 = vld [vmem:[%s1129_s0 + $0x60] sm:$0xff]  ;;  %v41_v31 = vld [vmem:[%s1129_s0 + $0x68] sm:$0xff] }
  0x15   :  { %753 = vmatprep.mubr.msk.f32.mxu0 %vm62_vm1, %v55_v12  ;;  %v42_v32 = vld [vmem:[%s1129_s0 + $0x70] sm:$0xff]  ;;  %v43_v33 = vld [vmem:[%s1129_s0 + $0x78] sm:$0xff]  ;;  %v667_v36 = vld [vmem:[%s1133_s4] ss:$0 sm:$0xff]  ;;  %p882_p3 = por %p881_p2, %p880_p1 }
  0x16   :  { %vm1083_vm5 = vmpackc.low %vm494_vm4, %vm494_vm4 }
  0x17   :  { %p883_p4 = pnand %p882_p3, %p876_p0 }
  0x18   :  { %754 = vmatmul.mubr.msk.f32.gmra.mrb[10].mxu0 %vm62_vm1, %v56_v13 }
  0x19   :  { %756 = vmatprep.mubr.msk.f32.mxu0 %vm62_vm1, %v57_v14 }
  0x1c   :  { %757 = vmatmul.mubr.msk.f32.gmra.mrb[12].mxu0 %vm62_vm1, %v58_v15 }
  0x1d   :  { %759 = vmatprep.mubr.msk.f32.mxu0 %vm62_vm1, %v59_v16 }
  0x20   :  { %760 = vmatmul.mubr.msk.f32.gmra.mrb[14].mxu0 %vm62_vm1, %v60_v17 }
  0x21   :  { %764 = vmatprep.mubr.msk.f32.mxu0 %vm260_vm2, %v28_v18 }
  0x24   :  { %765 = vmatmul.mubr.msk.f32.vlgmr.msra.gmra.mrb[0].mxu0 %vm260_vm2, %v29_v19 }
  0x25   :  { %767 = vmatprep.mubr.msk.f32.mxu0 %vm260_vm2, %v30_v20 }
  0x28   :  { %768 = vmatmul.mubr.msk.f32.gmra.mrb[2].mxu0 %vm260_vm2, %v31_v21 }
  0x29   :  { %770 = vmatprep.mubr.msk.f32.mxu0 %vm260_vm2, %v32_v22 }
  0x2c   :  { %771 = vmatmul.mubr.msk.f32.gmra.mrb[4].mxu0 %vm260_vm2, %v33_v23 }
  0x2d   :  { %773 = vmatprep.mubr.msk.f32.mxu0 %vm260_vm2, %v34_v24 }
  0x30   :  { %774 = vmatmul.mubr.msk.f32.gmra.mrb[6].mxu0 %vm260_vm2, %v35_v25 }
  0x31   :  { %776 = vmatprep.mubr.msk.f32.mxu0 %vm260_vm2, %v36_v26 }
  0x34   :  { %777 = vmatmul.mubr.msk.f32.gmra.mrb[8].mxu0 %vm260_vm2, %v37_v27 }
  0x35   :  { %779 = vmatprep.mubr.msk.f32.mxu0 %vm260_vm2, %v38_v28 }
  0x38   :  { %780 = vmatmul.mubr.msk.f32.gmra.mrb[10].mxu0 %vm260_vm2, %v39_v29 }
  0x39   :  { %782 = vmatprep.mubr.msk.f32.mxu0 %vm260_vm2, %v40_v30  ;;  %v493_v30 = vld [vmem:[%s1134_s5] sm:$0xff] }
  0x3c   :  { %783 = vmatmul.mubr.msk.f32.gmra.mrb[12].mxu0 %vm260_vm2, %v41_v31  ;;  %v617_v31 = vstv %s1135_s6 }
  0x3d   :  { %785 = vmatprep.mubr.msk.f32.mxu0 %vm260_vm2, %v42_v32 }
  0x40   :  { %786 = vmatmul.mubr.msk.f32.gmra.mrb[14].mxu0 %vm260_vm2, %v43_v33 }
  0xf7   :  { %v766_v37 = vpop.f32.mrb[0].mxu0 }
  0xf8   :  { %v462_v38 = vadd.f32 %v766_v37, %v667_v36  ;;  %v375_v39 = vpop.f32.mrb[1].mxu0 }
  0xf9   :  { %v461_v40 = vadd.f32 %v667_v36, %v375_v39 }
  0xfa   :  { %v478_v41 = vmax.f32 %v462_v38, 0.0 }
  0xfb   :  { %v477_v42 = vmax.f32 %v461_v40, 0.0  ;;  %v769_v43 = vpop.f32.mrb[2].mxu0 }
  0xfc   :  { %v464_v44 = vadd.f32 %v769_v43, %v667_v36  ;;  %v385_v45 = vpop.f32.mrb[3].mxu0 }
  0xfd   :  { %v824_v47 = vpack.c.bf16 %v478_v41, %v477_v42  ;;  %v463_v48 = vadd.f32 %v667_v36, %v385_v45 }
  0xfe   :  { %v480_v49 = vmax.f32 %v464_v44, 0.0 }
  0xff   :  { %v479_v50 = vmax.f32 %v463_v48, 0.0  ;;  %v772_v51 = vpop.f32.mrb[4].mxu0  ;;  %826 = vmatpush3.bf16.xpose.msk.msra.mxu1 %vm1083_vm5, %v824_v47 }
 0x100   :  { %v466_v52 = vadd.f32 %v772_v51, %v667_v36  ;;  %v395_v53 = vpop.f32.mrb[5].mxu0  ;;  %827 = vmatprep.subr.bf16.mxu1 %v899_v34 }
 0x101   :  { %v828_v54 = vpack.c.bf16 %v480_v49, %v479_v50  ;;  %v465_v55 = vadd.f32 %v667_v36, %v395_v53 }
 0x102   :  { %v482_v56 = vmax.f32 %v466_v52, 0.0 }
 0x103   :  { %v481_v57 = vmax.f32 %v465_v55, 0.0  ;;  %v775_v58 = vpop.f32.mrb[6].mxu0 }
 0x104   :  { %v468_v59 = vadd.f32 %v775_v58, %v667_v36  ;;  %v405_v60 = vpop.f32.mrb[7].mxu0 }
 0x105   :  { %v832_v61 = vpack.c.bf16 %v482_v56, %v481_v57  ;;  %v467_v62 = vadd.f32 %v667_v36, %v405_v60 }
 0x106   :  { %v484_v63 = vmax.f32 %v468_v59, 0.0 }
 0x107   :  { %v483_v0 = vmax.f32 %v467_v62, 0.0  ;;  %v778_v1 = vpop.f32.mrb[8].mxu0  ;;  %830 = vmatpush3.bf16.xpose.msk.msra.mxu1 %vm1083_vm5, %v828_v54 }
 0x108   :  { %v470_v2 = vadd.f32 %v778_v1, %v667_v36  ;;  %v415_v3 = vpop.f32.mrb[9].mxu0  ;;  %831 = vmatprep.subr.bf16.mxu1 %v899_v34 }
 0x109   :  { %v836_v4 = vpack.c.bf16 %v484_v63, %v483_v0  ;;  %v469_v5 = vadd.f32 %v667_v36, %v415_v3 }
 0x10a   :  { %v486_v6 = vmax.f32 %v470_v2, 0.0 }
 0x10b   :  { %v485_v7 = vmax.f32 %v469_v5, 0.0  ;;  %v781_v8 = vpop.f32.mrb[10].mxu0 }
 0x10c   :  { %v472_v9 = vadd.f32 %v781_v8, %v667_v36  ;;  %v425_v10 = vpop.f32.mrb[11].mxu0 }
 0x10d   :  { %v840_v11 = vpack.c.bf16 %v486_v6, %v485_v7  ;;  %v471_v12 = vadd.f32 %v667_v36, %v425_v10 }
 0x10e   :  { %v488_v13 = vmax.f32 %v472_v9, 0.0 }
 0x10f   :  { %v487_v14 = vmax.f32 %v471_v12, 0.0  ;;  %v784_v15 = vpop.f32.mrb[12].mxu0  ;;  %834 = vmatpush3.bf16.xpose.msk.msra.mxu1 %vm1083_vm5, %v832_v61 }
 0x110   :  { %v474_v16 = vadd.f32 %v784_v15, %v667_v36  ;;  %v435_v17 = vpop.f32.mrb[13].mxu0  ;;  %835 = vmatprep.subr.bf16.mxu1 %v899_v34 }
 0x111   :  { %v844_v18 = vpack.c.bf16 %v488_v13, %v487_v14  ;;  %v473_v19 = vadd.f32 %v667_v36, %v435_v17 }
 0x112   :  { %v490_v20 = vmax.f32 %v474_v16, 0.0 }
 0x113   :  { %v489_v21 = vmax.f32 %v473_v19, 0.0  ;;  %v787_v22 = vpop.f32.mrb[14].mxu0 }
 0x114   :  { %v476_v23 = vadd.f32 %v787_v22, %v667_v36  ;;  %v445_v24 = vpop.f32.mrb[15].mxu0 }
 0x115   :  { %v848_v25 = vpack.c.bf16 %v490_v20, %v489_v21  ;;  %v475_v26 = vadd.f32 %v667_v36, %v445_v24 }
 0x116   :  { %v492_v27 = vmax.f32 %v476_v23, 0.0 }
 0x117   :  { %v491_v28 = vmax.f32 %v475_v26, 0.0  ;;  %838 = vmatpush3.bf16.xpose.msk.msra.mxu1 %vm1083_vm5, %v836_v4 }
 0x118   :  { %839 = vmatprep.subr.bf16.mxu1 %v899_v34 }
 0x119   :  { %v852_v29 = vpack.c.bf16 %v492_v27, %v491_v28 }
 0x11f   :  { %842 = vmatpush3.bf16.xpose.msk.msra.mxu1 %vm1083_vm5, %v840_v11 }
 0x120   :  { %843 = vmatprep.subr.bf16.mxu1 %v899_v34 }
 0x127   :  { %846 = vmatpush3.bf16.xpose.msk.msra.mxu1 %vm1083_vm5, %v844_v18 }
 0x128   :  { %847 = vmatprep.subr.bf16.mxu1 %v899_v34 }
 0x12f   :  { %850 = vmatpush3.bf16.xpose.msk.msra.mxu1 %vm1083_vm5, %v848_v25 }
 0x130   :  { %851 = vmatprep.subr.bf16.mxu1 %v899_v34 }
 0x137   :  { %854 = vmatpush3.bf16.xpose.msk.msra.mxu1 %vm1083_vm5, %v852_v29 }
 0x13e   :  { %821 = vmatmul.mubr.msk.f32.vlgmr.msra.gmra.mrb[0].mxu1 %vm494_vm4, %v493_v30 }
 0x211   :  { %v612_v32 = vpop.f32.mrb[0].mxu1 }
 0x212   :  { %v618_v33 = vadd.f32 %v617_v31, %v612_v32  ;;  %v822_v35 = vpop.f32.mrb[1].mxu1 }
 0x214   :  { %619 = vst [vmem:[#allocation3] sm:$0x1] %v618_v33 }
 0x215   :  { %886 = shalt.err (!%p883_p4)
}
 0x216   :  { %s887_s24 = scalar_lea.hbm %s1136_s7, 16 }
 0x217   :  { %p888_p5 = scmp.ne.s32.totalorder %s1136_s7, %s887_s24  ;;  %p891_p6 = scmp.lt.u32.totalorder %s887_s24, %s1136_s7 }
 0x219   :  { %p893_p7 = pnand %p891_p6, %p888_p5 }
 0x21b   :  { %896 = shalt.err (!%p893_p7)
}
 0x21c   :  { %629 = dma.vmem_to_hbm [thread:$0]  %s627_s20, 16, %s1136_s7, [#allocation4]  }
 0x21d   :  { %897 = dma.done.wait [#allocation4], 16  }
 0x21e   :  { %898 = vsyncadd [#allocation4], 4294967280 }
 0x21f   :  { %633 = vsyncpa [#allocation4], 1 }

</bundles_post_ra>
